<compile_context>
chip_gen: v7x
topology: tpu7x:2x2x1
jax: 0.10.0
libtpu: 0.0.40
codegen_flags: <defaults>
</compile_context>

<pallas_src>
import jax
import jax.numpy as jnp
from jax.experimental import pallas as pl
from jax.experimental.pallas import tpu as pltpu

LANE = 128  # vreg lane width / MXU-friendly output-feature granularity


def _round_up(n, m):
    return (n + m - 1) // m * m


def mlp_kernel(x_ref,
               w1_ref, b1_ref, w2_ref, b2_ref, w3_ref, b3_ref,
               w4_ref, b4_ref, w5_ref, b5_ref, w6_ref, b6_ref,
               o_ref):
    """Fused 6-layer MLP on one (tile_b, features) batch tile.

    x and all weights are bf16 (weights lane-padded on their out dim);
    matmuls accumulate in f32; bias add / ReLU stay f32 (v5e-safe);
    the output store is lane-dense bf16.
    """
    h = x_ref[...]  # bf16 (tile_b, in_size)

    def linear(h, w_ref, b_ref):
        # astype is a no-op when h is already bf16 (layer 1).
        acc = jnp.dot(h.astype(jnp.bfloat16), w_ref[...],
                      preferred_element_type=jnp.float32)
        return acc + b_ref[...]

    h = jnp.maximum(linear(h, w1_ref, b1_ref), 0.0)
    h = jnp.maximum(linear(h, w2_ref, b2_ref), 0.0)
    h = jnp.maximum(linear(h, w3_ref, b3_ref), 0.0)
    h = jnp.maximum(linear(h, w4_ref, b4_ref), 0.0)
    h = jnp.maximum(linear(h, w5_ref, b5_ref), 0.0)
    h = linear(h, w6_ref, b6_ref)            # final layer: no ReLU
    o_ref[...] = h.astype(o_ref.dtype)       # lane-dense bf16 (tile_b, 128k) store


def neural_net_forward(x, params, *, tile_b=None):
    """x: [B, input_size] f32. params: list of (W[in,out] f32, b[out] f32)."""
    B, in_size = x.shape
    num_classes = params[-1][0].shape[1]

    # --- padded (lane-dense) output dims per layer ---------------------------
    out_dims = [w.shape[1] for (w, _) in params]
    out_p_dims = [_round_up(d, LANE) for d in out_dims]
    # Layer 1 keeps the real (unpadded) input feature dim; later layers take
    # the previous layer's lane-padded width.
    in_dims = [in_size] + out_p_dims[:-1]

    # --- batch tiling ---------------------------------------------------------
    b8 = _round_up(B, 8)                       # min sublane granularity
    if tile_b is None:
        MAX_TILE = 1024                        # big tiles: amortize per-step + MXU drain
        n_tiles = pl.cdiv(b8, MAX_TILE)
        if B > 64:
            # v7x has 2 TensorCores: keep >=2 parallel batch tiles so the
            # "parallel" grid axis actually shards (no effect on v5e/v6e).
            n_tiles = max(n_tiles, 2)
        tile_b = _round_up(pl.cdiv(b8, n_tiles), 8)   # even split, minimal pad
    tile_b = max(8, _round_up(tile_b, 8))
    b_pad = _round_up(b8, tile_b)
    grid = (b_pad // tile_b,)

    # --- input: pad batch rows only (if needed), cast to bf16 ----------------
    x_p = x
    if b_pad != B:
        x_p = jnp.pad(x_p, ((0, b_pad - B), (0, 0)))
    x_p = x_p.astype(jnp.bfloat16)

    flat_args = [x_p]
    in_specs = [pl.BlockSpec((tile_b, in_size), lambda i: (i, 0))]
    for li, (w, b) in enumerate(params):
        ip, op = in_dims[li], out_p_dims[li]
        w_p = jnp.pad(w, ((0, ip - w.shape[0]),
                          (0, op - w.shape[1]))).astype(jnp.bfloat16)
        b_p = jnp.pad(b, (0, op - b.shape[0])).reshape(1, op).astype(jnp.float32)
        flat_args += [w_p, b_p]
        # Weights/biases stay VMEM-resident across the batch grid (block (0,0)).
        in_specs += [pl.BlockSpec((ip, op), lambda i: (0, 0)),
                     pl.BlockSpec((1, op), lambda i: (0, 0))]

    out_p = out_p_dims[-1]
    out_padded = pl.pallas_call(
        mlp_kernel,
        out_shape=jax.ShapeDtypeStruct((b_pad, out_p), jnp.bfloat16),
        grid=grid,
        in_specs=in_specs,
        out_specs=pl.BlockSpec((tile_b, out_p), lambda i: (i, 0)),
        compiler_params=pltpu.CompilerParams(
            dimension_semantics=("parallel",)),   # shard batch tiles on v7x TCs
    )(*flat_args)

    # Upcast + slice the padding off in the wrapper (cheap; kernel stays lane-dense).
    return out_padded[:B, :num_classes].astype(jnp.float32)


def init_params(key, input_size, hidden_size, num_classes):
    """Deterministic init matching nn.Linear shapes (weights stored as (in, out))."""
    dims = [input_size] + [hidden_size] * 5 + [num_classes]
    params = []
    for i in range(6):
        key, kw, kb = jax.random.split(key, 3)
        fan_in, fan_out = dims[i], dims[i + 1]
        bound = 1.0 / (fan_in ** 0.5)    # PyTorch nn.Linear-style uniform bound
        w = jax.random.uniform(kw, (fan_in, fan_out), jnp.float32, -bound, bound)
        b = jax.random.uniform(kb, (fan_out,), jnp.float32, -bound, bound)
        params.append((w, b))
    return params


def reference_forward(x, params):
    """Pure-JAX reference with the same bf16-matmul / f32-accumulate recipe."""
    h = x
    for i, (w, b) in enumerate(params):
        h = jnp.dot(h.astype(jnp.bfloat16), w.astype(jnp.bfloat16),
                    preferred_element_type=jnp.float32) + b
        if i < len(params) - 1:
            h = jnp.maximum(h, 0.0)
    return h


if __name__ == "__main__":
    key = jax.random.PRNGKey(0)
    batch, input_size, hidden_size, num_classes = 8, 64, 32, 16

    kx, kp = jax.random.split(key)
    x = jax.random.normal(kx, (batch, input_size), jnp.float32)
    params = init_params(kp, input_size, hidden_size, num_classes)

    out = neural_net_forward(x, params)
    out = jax.block_until_ready(out)

    ref = reference_forward(x, params)
    assert out.shape == (batch, num_classes), out.shape
    # Kernel stores final logits in bf16 (upcast in wrapper) -> looser tolerance.
    assert jnp.allclose(out, ref, atol=1e-2, rtol=1e-2), \
        float(jnp.max(jnp.abs(out - ref)))

    print("KERNEL_OK")
</pallas_src>

<mosaic_0001>
module attributes {stable_mosaic.version = 11 : i64} {
  func.func @mlp_kernel(%arg0: i32, %arg1: memref<8x64xbf16, #tpu.memory_space<vmem>>, %arg2: memref<64x128xbf16, #tpu.memory_space<vmem>>, %arg3: memref<1x128xf32, #tpu.memory_space<vmem>>, %arg4: memref<128x128xbf16, #tpu.memory_space<vmem>>, %arg5: memref<1x128xf32, #tpu.memory_space<vmem>>, %arg6: memref<128x128xbf16, #tpu.memory_space<vmem>>, %arg7: memref<1x128xf32, #tpu.memory_space<vmem>>, %arg8: memref<128x128xbf16, #tpu.memory_space<vmem>>, %arg9: memref<1x128xf32, #tpu.memory_space<vmem>>, %arg10: memref<128x128xbf16, #tpu.memory_space<vmem>>, %arg11: memref<1x128xf32, #tpu.memory_space<vmem>>, %arg12: memref<128x128xbf16, #tpu.memory_space<vmem>>, %arg13: memref<1x128xf32, #tpu.memory_space<vmem>>, %arg14: memref<8x128xbf16, #tpu.memory_space<vmem>>) attributes {dimension_semantics = [#tpu.dimension_semantics<parallel>], iteration_bounds = array<i64: 1>, scalar_prefetch = 0 : i64, scratch_operands = 0 : i64, tpu.core_type = #tpu.core_type<tc>, window_params = [{transform_indices = @transform_0, window_bounds = array<i64: 8, 64>}, {pipeline_mode = #tpu.pipeline_mode<synchronous>, transform_indices = @transform_1, window_bounds = array<i64: 64, 128>}, {pipeline_mode = #tpu.pipeline_mode<synchronous>, transform_indices = @transform_2, window_bounds = array<i64: 1, 128>}, {pipeline_mode = #tpu.pipeline_mode<synchronous>, transform_indices = @transform_3, window_bounds = array<i64: 128, 128>}, {pipeline_mode = #tpu.pipeline_mode<synchronous>, transform_indices = @transform_4, window_bounds = array<i64: 1, 128>}, {pipeline_mode = #tpu.pipeline_mode<synchronous>, transform_indices = @transform_5, window_bounds = array<i64: 128, 128>}, {pipeline_mode = #tpu.pipeline_mode<synchronous>, transform_indices = @transform_6, window_bounds = array<i64: 1, 128>}, {pipeline_mode = #tpu.pipeline_mode<synchronous>, transform_indices = @transform_7, window_bounds = array<i64: 128, 128>}, {pipeline_mode = #tpu.pipeline_mode<synchronous>, transform_indices = @transform_8, window_bounds = array<i64: 1, 128>}, {pipeline_mode = #tpu.pipeline_mode<synchronous>, transform_indices = @transform_9, window_bounds = array<i64: 128, 128>}, {pipeline_mode = #tpu.pipeline_mode<synchronous>, transform_indices = @transform_10, window_bounds = array<i64: 1, 128>}, {pipeline_mode = #tpu.pipeline_mode<synchronous>, transform_indices = @transform_11, window_bounds = array<i64: 128, 128>}, {pipeline_mode = #tpu.pipeline_mode<synchronous>, transform_indices = @transform_12, window_bounds = array<i64: 1, 128>}, {transform_indices = @transform_13, window_bounds = array<i64: 8, 128>}]} {
    %c0 = arith.constant 0 : index
    %c0_0 = arith.constant 0 : index
    %0 = vector.load %arg1[%c0, %c0_0] : memref<8x64xbf16, #tpu.memory_space<vmem>>, vector<8x64xbf16>
    %c0_1 = arith.constant 0 : index
    %c0_2 = arith.constant 0 : index
    %1 = vector.load %arg2[%c0_1, %c0_2] : memref<64x128xbf16, #tpu.memory_space<vmem>>, vector<64x128xbf16>
    %cst = arith.constant dense<0.000000e+00> : vector<8x128xf32>
    %2 = tpu.matmul %0, %1, %cst {dimension_numbers = #tpu.dot_dimension_numbers<[1], [0], [0], [1], [0, 0, 1, 1], [], []>} : vector<8x64xbf16>, vector<64x128xbf16>, vector<8x128xf32> -> vector<8x128xf32>
    %c0_3 = arith.constant 0 : index
    %c0_4 = arith.constant 0 : index
    %3 = vector.load %arg3[%c0_3, %c0_4] : memref<1x128xf32, #tpu.memory_space<vmem>>, vector<1x128xf32>
    %4 = vector.broadcast %3 : vector<1x128xf32> to vector<8x128xf32>
    %5 = arith.addf %2, %4 : vector<8x128xf32>
    %cst_5 = arith.constant 0.000000e+00 : f32
    %6 = vector.broadcast %cst_5 : f32 to vector<8x128xf32>
    %7 = arith.maximumf %5, %6 : vector<8x128xf32>
    %8 = arith.truncf %7 : vector<8x128xf32> to vector<8x128xbf16>
    %c0_6 = arith.constant 0 : index
    %c0_7 = arith.constant 0 : index
    %9 = vector.load %arg4[%c0_6, %c0_7] : memref<128x128xbf16, #tpu.memory_space<vmem>>, vector<128x128xbf16>
    %cst_8 = arith.constant dense<0.000000e+00> : vector<8x128xf32>
    %10 = tpu.matmul %8, %9, %cst_8 {dimension_numbers = #tpu.dot_dimension_numbers<[1], [0], [0], [1], [0, 0, 1, 1], [], []>} : vector<8x128xbf16>, vector<128x128xbf16>, vector<8x128xf32> -> vector<8x128xf32>
    %c0_9 = arith.constant 0 : index
    %c0_10 = arith.constant 0 : index
    %11 = vector.load %arg5[%c0_9, %c0_10] : memref<1x128xf32, #tpu.memory_space<vmem>>, vector<1x128xf32>
    %12 = vector.broadcast %11 : vector<1x128xf32> to vector<8x128xf32>
    %13 = arith.addf %10, %12 : vector<8x128xf32>
    %cst_11 = arith.constant 0.000000e+00 : f32
    %14 = vector.broadcast %cst_11 : f32 to vector<8x128xf32>
    %15 = arith.maximumf %13, %14 : vector<8x128xf32>
    %16 = arith.truncf %15 : vector<8x128xf32> to vector<8x128xbf16>
    %c0_12 = arith.constant 0 : index
    %c0_13 = arith.constant 0 : index
    %17 = vector.load %arg6[%c0_12, %c0_13] : memref<128x128xbf16, #tpu.memory_space<vmem>>, vector<128x128xbf16>
    %cst_14 = arith.constant dense<0.000000e+00> : vector<8x128xf32>
    %18 = tpu.matmul %16, %17, %cst_14 {dimension_numbers = #tpu.dot_dimension_numbers<[1], [0], [0], [1], [0, 0, 1, 1], [], []>} : vector<8x128xbf16>, vector<128x128xbf16>, vector<8x128xf32> -> vector<8x128xf32>
    %c0_15 = arith.constant 0 : index
    %c0_16 = arith.constant 0 : index
    %19 = vector.load %arg7[%c0_15, %c0_16] : memref<1x128xf32, #tpu.memory_space<vmem>>, vector<1x128xf32>
    %20 = vector.broadcast %19 : vector<1x128xf32> to vector<8x128xf32>
    %21 = arith.addf %18, %20 : vector<8x128xf32>
    %cst_17 = arith.constant 0.000000e+00 : f32
    %22 = vector.broadcast %cst_17 : f32 to vector<8x128xf32>
    %23 = arith.maximumf %21, %22 : vector<8x128xf32>
    %24 = arith.truncf %23 : vector<8x128xf32> to vector<8x128xbf16>
    %c0_18 = arith.constant 0 : index
    %c0_19 = arith.constant 0 : index
    %25 = vector.load %arg8[%c0_18, %c0_19] : memref<128x128xbf16, #tpu.memory_space<vmem>>, vector<128x128xbf16>
    %cst_20 = arith.constant dense<0.000000e+00> : vector<8x128xf32>
    %26 = tpu.matmul %24, %25, %cst_20 {dimension_numbers = #tpu.dot_dimension_numbers<[1], [0], [0], [1], [0, 0, 1, 1], [], []>} : vector<8x128xbf16>, vector<128x128xbf16>, vector<8x128xf32> -> vector<8x128xf32>
    %c0_21 = arith.constant 0 : index
    %c0_22 = arith.constant 0 : index
    %27 = vector.load %arg9[%c0_21, %c0_22] : memref<1x128xf32, #tpu.memory_space<vmem>>, vector<1x128xf32>
    %28 = vector.broadcast %27 : vector<1x128xf32> to vector<8x128xf32>
    %29 = arith.addf %26, %28 : vector<8x128xf32>
    %cst_23 = arith.constant 0.000000e+00 : f32
    %30 = vector.broadcast %cst_23 : f32 to vector<8x128xf32>
    %31 = arith.maximumf %29, %30 : vector<8x128xf32>
    %32 = arith.truncf %31 : vector<8x128xf32> to vector<8x128xbf16>
    %c0_24 = arith.constant 0 : index
    %c0_25 = arith.constant 0 : index
    %33 = vector.load %arg10[%c0_24, %c0_25] : memref<128x128xbf16, #tpu.memory_space<vmem>>, vector<128x128xbf16>
    %cst_26 = arith.constant dense<0.000000e+00> : vector<8x128xf32>
    %34 = tpu.matmul %32, %33, %cst_26 {dimension_numbers = #tpu.dot_dimension_numbers<[1], [0], [0], [1], [0, 0, 1, 1], [], []>} : vector<8x128xbf16>, vector<128x128xbf16>, vector<8x128xf32> -> vector<8x128xf32>
    %c0_27 = arith.constant 0 : index
    %c0_28 = arith.constant 0 : index
    %35 = vector.load %arg11[%c0_27, %c0_28] : memref<1x128xf32, #tpu.memory_space<vmem>>, vector<1x128xf32>
    %36 = vector.broadcast %35 : vector<1x128xf32> to vector<8x128xf32>
    %37 = arith.addf %34, %36 : vector<8x128xf32>
    %cst_29 = arith.constant 0.000000e+00 : f32
    %38 = vector.broadcast %cst_29 : f32 to vector<8x128xf32>
    %39 = arith.maximumf %37, %38 : vector<8x128xf32>
    %40 = arith.truncf %39 : vector<8x128xf32> to vector<8x128xbf16>
    %c0_30 = arith.constant 0 : index
    %c0_31 = arith.constant 0 : index
    %41 = vector.load %arg12[%c0_30, %c0_31] : memref<128x128xbf16, #tpu.memory_space<vmem>>, vector<128x128xbf16>
    %cst_32 = arith.constant dense<0.000000e+00> : vector<8x128xf32>
    %42 = tpu.matmul %40, %41, %cst_32 {dimension_numbers = #tpu.dot_dimension_numbers<[1], [0], [0], [1], [0, 0, 1, 1], [], []>} : vector<8x128xbf16>, vector<128x128xbf16>, vector<8x128xf32> -> vector<8x128xf32>
    %c0_33 = arith.constant 0 : index
    %c0_34 = arith.constant 0 : index
    %43 = vector.load %arg13[%c0_33, %c0_34] : memref<1x128xf32, #tpu.memory_space<vmem>>, vector<1x128xf32>
    %44 = vector.broadcast %43 : vector<1x128xf32> to vector<8x128xf32>
    %45 = arith.addf %42, %44 : vector<8x128xf32>
    %46 = arith.truncf %45 : vector<8x128xf32> to vector<8x128xbf16>
    %c0_35 = arith.constant 0 : index
    %c0_36 = arith.constant 0 : index
    %47 = vector.load %arg14[%c0_35, %c0_36] : memref<8x128xbf16, #tpu.memory_space<vmem>>, vector<8x128xbf16>
    tpu.vector_store %arg14[%c0_35, %c0_36], %46 {strides = array<i32>} : memref<8x128xbf16, #tpu.memory_space<vmem>>, vector<8x128xbf16>,
    return
  }
  func.func @transform_0(%arg0: i32) -> (i32, i32) {
    %c0_i32 = arith.constant 0 : i32
    %c0_i32_0 = arith.constant 0 : i32
    return %arg0, %c0_i32 : i32, i32
  }
  func.func @transform_1(%arg0: i32) -> (i32, i32) {
    %c0_i32 = arith.constant 0 : i32
    %c0_i32_0 = arith.constant 0 : i32
    %c0_i32_1 = arith.constant 0 : i32
    return %c0_i32, %c0_i32_0 : i32, i32
  }
  func.func @transform_2(%arg0: i32) -> (i32, i32) {
    %c0_i32 = arith.constant 0 : i32
    %c0_i32_0 = arith.constant 0 : i32
    %c0_i32_1 = arith.constant 0 : i32
    return %c0_i32, %c0_i32_0 : i32, i32
  }
  func.func @transform_3(%arg0: i32) -> (i32, i32) {
    %c0_i32 = arith.constant 0 : i32
    %c0_i32_0 = arith.constant 0 : i32
    %c0_i32_1 = arith.constant 0 : i32
    return %c0_i32, %c0_i32_0 : i32, i32
  }
  func.func @transform_4(%arg0: i32) -> (i32, i32) {
    %c0_i32 = arith.constant 0 : i32
    %c0_i32_0 = arith.constant 0 : i32
    %c0_i32_1 = arith.constant 0 : i32
    return %c0_i32, %c0_i32_0 : i32, i32
  }
  func.func @transform_5(%arg0: i32) -> (i32, i32) {
    %c0_i32 = arith.constant 0 : i32
    %c0_i32_0 = arith.constant 0 : i32
    %c0_i32_1 = arith.constant 0 : i32
    return %c0_i32, %c0_i32_0 : i32, i32
  }
  func.func @transform_6(%arg0: i32) -> (i32, i32) {
    %c0_i32 = arith.constant 0 : i32
    %c0_i32_0 = arith.constant 0 : i32
    %c0_i32_1 = arith.constant 0 : i32
    return %c0_i32, %c0_i32_0 : i32, i32
  }
  func.func @transform_7(%arg0: i32) -> (i32, i32) {
    %c0_i32 = arith.constant 0 : i32
    %c0_i32_0 = arith.constant 0 : i32
    %c0_i32_1 = arith.constant 0 : i32
    return %c0_i32, %c0_i32_0 : i32, i32
  }
  func.func @transform_8(%arg0: i32) -> (i32, i32) {
    %c0_i32 = arith.constant 0 : i32
    %c0_i32_0 = arith.constant 0 : i32
    %c0_i32_1 = arith.constant 0 : i32
    return %c0_i32, %c0_i32_0 : i32, i32
  }
  func.func @transform_9(%arg0: i32) -> (i32, i32) {
    %c0_i32 = arith.constant 0 : i32
    %c0_i32_0 = arith.constant 0 : i32
    %c0_i32_1 = arith.constant 0 : i32
    return %c0_i32, %c0_i32_0 : i32, i32
  }
  func.func @transform_10(%arg0: i32) -> (i32, i32) {
    %c0_i32 = arith.constant 0 : i32
    %c0_i32_0 = arith.constant 0 : i32
    %c0_i32_1 = arith.constant 0 : i32
    return %c0_i32, %c0_i32_0 : i32, i32
  }
  func.func @transform_11(%arg0: i32) -> (i32, i32) {
    %c0_i32 = arith.constant 0 : i32
    %c0_i32_0 = arith.constant 0 : i32
    %c0_i32_1 = arith.constant 0 : i32
    return %c0_i32, %c0_i32_0 : i32, i32
  }
  func.func @transform_12(%arg0: i32) -> (i32, i32) {
    %c0_i32 = arith.constant 0 : i32
    %c0_i32_0 = arith.constant 0 : i32
    %c0_i32_1 = arith.constant 0 : i32
    return %c0_i32, %c0_i32_0 : i32, i32
  }
  func.func @transform_13(%arg0: i32) -> (i32, i32) {
    %c0_i32 = arith.constant 0 : i32
    %c0_i32_0 = arith.constant 0 : i32
    return %arg0, %c0_i32 : i32, i32
  }
}

</mosaic_0001>

<bundles_post_ra>
// kernel: tpu_custom_call.1
= control target key start
LH: loop header
LB: loop body
LE: loop exit
PB: predicated region body
PF: predicated region fallthrough
CT: control target
= control target key end

     0   :  { %18 = vsyncpa [#allocation3], 0  ;;  %s1533_s0 = inlined_call_operand.hbm [shape: bf16[8,64], index: 0, kind: input, shape index: {}]   ;;  %s1534_s1 = inlined_call_operand.hbm [shape: bf16[64,128], index: 1, kind: input, shape index: {}]   ;;  %s1535_s2 = inlined_call_operand.vmem [shape: f32[1,128], index: 2, kind: input, shape index: {}]   ;;  %s1536_s3 = inlined_call_operand.hbm [shape: bf16[128,128], index: 3, kind: input, shape index: {}]   ;;  %s1537_s4 = inlined_call_operand.vmem [shape: f32[1,128], index: 4, kind: input, shape index: {}]   ;;  %s1538_s5 = inlined_call_operand.hbm [shape: bf16[128,128], index: 5, kind: input, shape index: {}]   ;;  %s1539_s6 = inlined_call_operand.vmem [shape: f32[1,128], index: 6, kind: input, shape index: {}]   ;;  %s1540_s7 = inlined_call_operand.hbm [shape: bf16[128,128], index: 7, kind: input, shape index: {}]   ;;  %s1541_s8 = inlined_call_operand.vmem [shape: f32[1,128], index: 8, kind: input, shape index: {}]   ;;  %s1542_s9 = inlined_call_operand.hbm [shape: bf16[128,128], index: 9, kind: input, shape index: {}]   ;;  %s1543_s10 = inlined_call_operand.vmem [shape: f32[1,128], index: 10, kind: input, shape index: {}]   ;;  %s1544_s11 = inlined_call_operand.hbm [shape: bf16[128,128], index: 11, kind: input, shape index: {}]   ;;  %s1545_s12 = inlined_call_operand.vmem [shape: f32[1,128], index: 12, kind: input, shape index: {}]   ;;  %s1546_s13 = inlined_call_operand.hbm [shape: bf16[8,128], index: 13, kind: output, shape index: {}]  }
   0x1   :  { %19 = vsyncpa [#allocation6], 0 }
   0x2   :  { %20 = vsyncpa [#allocation9], 0 }
   0x3   :  { %21 = vsyncpa [#allocation12], 0 }
   0x4   :  { %22 = vsyncpa [#allocation4], 0  ;;  %s1263_s25 = smov [#allocation5]   ;;  %s1077_s29 = scalar_lea.hbm %s1534_s1, 512 }
   0x5   :  { %s38_s26 = sshll.u32 %s1263_s25, 4  ;;  %p1078_p0 = scmp.ne.s32.totalorder %s1534_s1, %s1077_s29  ;;  %s39_s26 = int_to_ptr.vmem [resolvable:$true] %s38_s26 }
   0x6   :  { %p1081_p1 = scmp.lt.u32.totalorder %s1077_s29, %s1534_s1 }
   0x8   :  { %p1083_p2 = pnand %p1081_p1, %p1078_p0 }
   0xa   :  { %1086 = shalt.err (!%p1083_p2)
}
   0xb   :  { %s1087_s17 = scalar_lea.vmem %s39_s26, 512  ;;  %p1092_p4 = scmp.lt.s32.totalorder %s39_s26, %s39_s26 }
   0xc   :  { %p1088_p3 = scmp.ne.s32.totalorder %s39_s26, %s1087_s17  ;;  %p1093_p5 = scmp.lt.s32.totalorder %s1087_s17, %s1087_s17 }
   0xe   :  { %p1094_p6 = por %p1093_p5, %p1092_p4 }
  0x10   :  { %p1095_p7 = pnand %p1094_p6, %p1088_p3 }
  0x12   :  { %1098 = shalt.err (!%p1095_p7)
}
  0x13   :  { %s1264_s18 = smov 64   ;;  %s1265_s19 = smov 4  }
  0x14   :  { %44 = dma.hbm_to_vmem [thread:$0]  %s1534_s1, 512, %s39_s26, [#allocation6], %s1264_s18, %s1264_s18, %s1265_s19  }
  0x15   :  { %s1266_s22 = smov [#allocation8]   ;;  %s1267_s24 = smov [#allocation11]  }
  0x16   :  { %s66_s23 = sshll.u32 %s1266_s22, 4  ;;  %s94_s25 = sshll.u32 %s1267_s24, 4  ;;  %s67_s23 = int_to_ptr.vmem [resolvable:$true] %s66_s23  ;;  %s95_s25 = int_to_ptr.vmem [resolvable:$true] %s94_s25 }
  0x17   :  { %s1099_s29 = scalar_lea.hbm %s1538_s5, 1024 }
  0x18   :  { %p1100_p8 = scmp.ne.s32.totalorder %s1538_s5, %s1099_s29  ;;  %p1103_p9 = scmp.lt.u32.totalorder %s1099_s29, %s1538_s5 }
  0x1a   :  { %p1105_p10 = pnand %p1103_p9, %p1100_p8 }
  0x1c   :  { %1108 = shalt.err (!%p1105_p10)
}
  0x1d   :  { %s1109_s1 = scalar_lea.vmem %s67_s23, 1024  ;;  %p1114_p12 = scmp.lt.s32.totalorder %s67_s23, %s67_s23 }
  0x1e   :  { %p1110_p11 = scmp.ne.s32.totalorder %s67_s23, %s1109_s1  ;;  %p1115_p13 = scmp.lt.s32.totalorder %s1109_s1, %s1109_s1 }
  0x20   :  { %p1116_p0 = por %p1115_p13, %p1114_p12 }
  0x22   :  { %p1117_p1 = pnand %p1116_p0, %p1110_p11 }
  0x24   :  { %1120 = shalt.err (!%p1117_p1)
}
  0x25   :  { %72 = dma.hbm_to_vmem [thread:$0]  %s1538_s5, 1024, %s67_s23, [#allocation9], %s1264_s18, %s1264_s18, %s1265_s19  }
  0x26   :  { %s1121_s22 = scalar_lea.hbm %s1542_s9, 1024 }
  0x27   :  { %p1122_p2 = scmp.ne.s32.totalorder %s1542_s9, %s1121_s22  ;;  %p1125_p3 = scmp.lt.u32.totalorder %s1121_s22, %s1542_s9 }
  0x29   :  { %p1127_p4 = pnand %p1125_p3, %p1122_p2 }
  0x2b   :  { %1130 = shalt.err (!%p1127_p4)
}
  0x2c   :  { %s1131_s30 = scalar_lea.vmem %s95_s25, 1024  ;;  %p1136_p6 = scmp.lt.s32.totalorder %s95_s25, %s95_s25 }
  0x2d   :  { %p1132_p5 = scmp.ne.s32.totalorder %s95_s25, %s1131_s30  ;;  %p1137_p7 = scmp.lt.s32.totalorder %s1131_s30, %s1131_s30 }
  0x2f   :  { %p1138_p8 = por %p1137_p7, %p1136_p6 }
  0x31   :  { %p1139_p9 = pnand %p1138_p8, %p1132_p5 }
  0x33   :  { %1142 = shalt.err (!%p1139_p9)
}
  0x34   :  { %100 = dma.hbm_to_vmem [thread:$0]  %s1542_s9, 1024, %s95_s25, [#allocation12], %s1264_s18, %s1264_s18, %s1265_s19  }
  0x35   :  { %s1268_s14 = smov [#allocation2]   ;;  %s1269_s16 = smov [#allocation7]  }
  0x36   :  { %s29_s15 = sshll.u32 %s1268_s14, 4  ;;  %s52_s1 = sshll.u32 %s1269_s16, 4  ;;  %s30_s15 = int_to_ptr.vmem [resolvable:$true] %s29_s15  ;;  %s53_s1 = int_to_ptr.vmem [resolvable:$true] %s52_s1 }
  0x37   :  { %s1143_s20 = scalar_lea.hbm %s1533_s0, 64 }
  0x38   :  { %p1144_p10 = scmp.ne.s32.totalorder %s1533_s0, %s1143_s20  ;;  %p1147_p11 = scmp.lt.u32.totalorder %s1143_s20, %s1533_s0 }
  0x3a   :  { %p1149_p12 = pnand %p1147_p11, %p1144_p10 }
  0x3c   :  { %1152 = shalt.err (!%p1149_p12)
}
  0x3d   :  { %s1153_s9 = scalar_lea.vmem %s30_s15, 64  ;;  %p1158_p0 = scmp.lt.s32.totalorder %s30_s15, %s30_s15 }
  0x3e   :  { %p1154_p13 = scmp.ne.s32.totalorder %s30_s15, %s1153_s9  ;;  %p1159_p1 = scmp.lt.s32.totalorder %s1153_s9, %s1153_s9 }
  0x40   :  { %p1160_p2 = por %p1159_p1, %p1158_p0 }
  0x42   :  { %p1161_p3 = pnand %p1160_p2, %p1154_p13 }
  0x44   :  { %1164 = shalt.err (!%p1161_p3)
}
  0x45   :  { %32 = dma.hbm_to_vmem [thread:$0]  %s1533_s0, 64, %s30_s15, [#allocation3]  }
  0x46   :  { %s1165_s5 = scalar_lea.hbm %s1536_s3, 1024 }
  0x47   :  { %p1166_p4 = scmp.ne.s32.totalorder %s1536_s3, %s1165_s5  ;;  %p1169_p5 = scmp.lt.u32.totalorder %s1165_s5, %s1536_s3 }
  0x49   :  { %p1171_p6 = pnand %p1169_p5, %p1166_p4 }
  0x4b   :  { %1174 = shalt.err (!%p1171_p6)
}
  0x4c   :  { %s1175_s17 = scalar_lea.vmem %s53_s1, 1024  ;;  %p1180_p8 = scmp.lt.s32.totalorder %s53_s1, %s53_s1 }
  0x4d   :  { %p1176_p7 = scmp.ne.s32.totalorder %s53_s1, %s1175_s17  ;;  %p1181_p9 = scmp.lt.s32.totalorder %s1175_s17, %s1175_s17 }
  0x4f   :  { %p1182_p10 = por %p1181_p9, %p1180_p8 }
  0x51   :  { %p1183_p11 = pnand %p1182_p10, %p1176_p7 }
  0x53   :  { %1186 = shalt.err (!%p1183_p11)
}
  0x54   :  { %58 = dma.hbm_to_vmem [thread:$0]  %s1536_s3, 1024, %s53_s1, [#allocation6], %s1264_s18, %s1264_s18, %s1265_s19  }
  0x55   :  { %s1270_s20 = smov [#allocation10]   ;;  %s1271_s22 = smov [#allocation13]  }
  0x56   :  { %s80_s21 = sshll.u32 %s1270_s20, 4  ;;  %s108_s24 = sshll.u32 %s1271_s22, 4  ;;  %s81_s21 = int_to_ptr.vmem [resolvable:$true] %s80_s21  ;;  %s109_s24 = int_to_ptr.vmem [resolvable:$true] %s108_s24 }
  0x57   :  { %s1187_s25 = scalar_lea.hbm %s1540_s7, 1024 }
  0x58   :  { %p1188_p12 = scmp.ne.s32.totalorder %s1540_s7, %s1187_s25  ;;  %p1191_p13 = scmp.lt.u32.totalorder %s1187_s25, %s1540_s7 }
  0x5a   :  { %p1193_p0 = pnand %p1191_p13, %p1188_p12 }
  0x5c   :  { %1196 = shalt.err (!%p1193_p0)
}
  0x5d   :  { %s1197_s3 = scalar_lea.vmem %s81_s21, 1024  ;;  %p1202_p2 = scmp.lt.s32.totalorder %s81_s21, %s81_s21 }
  0x5e   :  { %p1198_p1 = scmp.ne.s32.totalorder %s81_s21, %s1197_s3  ;;  %p1203_p3 = scmp.lt.s32.totalorder %s1197_s3, %s1197_s3 }
  0x60   :  { %p1204_p4 = por %p1203_p3, %p1202_p2 }
  0x62   :  { %p1205_p5 = pnand %p1204_p4, %p1198_p1 }
  0x64   :  { %1208 = shalt.err (!%p1205_p5)
}
  0x65   :  { %86 = dma.hbm_to_vmem [thread:$0]  %s1540_s7, 1024, %s81_s21, [#allocation9], %s1264_s18, %s1264_s18, %s1265_s19  }
  0x66   :  { %s1209_s26 = scalar_lea.hbm %s1544_s11, 1024 }
  0x67   :  { %p1210_p6 = scmp.ne.s32.totalorder %s1544_s11, %s1209_s26  ;;  %p1213_p7 = scmp.lt.u32.totalorder %s1209_s26, %s1544_s11 }
  0x69   :  { %p1215_p8 = pnand %p1213_p7, %p1210_p6 }
  0x6b   :  { %1218 = shalt.err (!%p1215_p8)
}
  0x6c   :  { %s1219_s22 = scalar_lea.vmem %s109_s24, 1024  ;;  %p1224_p10 = scmp.lt.s32.totalorder %s109_s24, %s109_s24 }
  0x6d   :  { %p1220_p9 = scmp.ne.s32.totalorder %s109_s24, %s1219_s22  ;;  %p1225_p11 = scmp.lt.s32.totalorder %s1219_s22, %s1219_s22 }
  0x6f   :  { %p1226_p12 = por %p1225_p11, %p1224_p10 }
  0x71   :  { %p1227_p13 = pnand %p1226_p12, %p1220_p9 }
  0x73   :  { %1230 = shalt.err (!%p1227_p13)
}
  0x74   :  { %114 = dma.hbm_to_vmem [thread:$0]  %s1544_s11, 1024, %s109_s24, [#allocation12], %s1264_s18, %s1264_s18, %s1265_s19  }
  0x75   :  { %1253 = dma.done.wait [#allocation3], 64  }
  0x76   :  { %1254 = vsyncadd [#allocation3], 4294967232 }
  0x77   :  { %1255 = dma.done.wait [#allocation6], 1536  }
  0x78   :  { %1256 = vsyncadd [#allocation6], 4294965760 }
  0x79   :  { %1257 = dma.done.wait [#allocation9], 2048  }
  0x7a   :  { %1258 = vsyncadd [#allocation9], 4294965248 }
  0x7b   :  { %1259 = dma.done.wait [#allocation12], 2048  }
  0x7c   :  { %1260 = vsyncadd [#allocation12], 4294965248  ;;  %v1272_v0 = vmov 0.0   ;;  %vm1273_vm0 = vmmov 0   ;;  %v1033_v1 = vld [vmem:[#allocation5] sm:$0xff]   ;;  %v1034_v2 = vld [vmem:[#allocation5 + $0x8] sm:$0xff]  }
  0x7d   :  { %909 = vmatprep.subr.bf16.mxu0 %v1272_v0  ;;  %917 = vmatprep.mubr.msk.bf16.mxu0 %vm1273_vm0, %v1272_v0  ;;  %v1037_v3 = vld [vmem:[#allocation7] sm:$0xff]   ;;  %v1035_v4 = vld [vmem:[#allocation5 + $0x10] sm:$0xff]   ;;  %v1038_v5 = vld [vmem:[#allocation7 + $0x8] sm:$0xff]   ;;  %vm179_vm1 = vcmask 523264   ;;  %s1274_s29 = smov [#allocation14]  }
  0x7e   :  { %921 = vmatprep.subr.bf16.mxu1 %v1272_v0  ;;  %937 = vmatprep.mubr.msk.bf16.mxu1 %vm1273_vm0, %v1272_v0  ;;  %v1036_v6 = vld [vmem:[#allocation5 + $0x18] sm:$0xff]   ;;  %v1039_v7 = vld [vmem:[#allocation7 + $0x10] sm:$0xff]   ;;  %v1041_v10 = vld [vmem:[#allocation7 + $0x20] sm:$0xff]   ;;  %s796_s30 = sshll.u32 %s1274_s29, 4  ;;  %s797_s30 = int_to_ptr.vmem [resolvable:$true] %s796_s30 }
  0x7f   :  { %910 = vmatpush3.bf16.msra.mxu0 %v1033_v1  ;;  %922 = vmatpush3.bf16.msra.mxu1 %v1037_v3  ;;  %v139_v8 = vld [vmem:[#allocation2] sm:$0xf]  ;;  %v1042_v11 = vld [vmem:[#allocation7 + $0x28] sm:$0xff]   ;;  %v1043_v12 = vld [vmem:[#allocation7 + $0x30] sm:$0xff]   ;;  %p1236_p1 = scmp.lt.s32.totalorder %s797_s30, %s797_s30 }
  0x80   :  { %911 = vmatprep.subr.bf16.mxu0 %v1272_v0  ;;  %923 = vmatprep.subr.bf16.mxu1 %v1272_v0  ;;  %v1040_v9 = vld [vmem:[#allocation7 + $0x18] sm:$0xff]   ;;  %v1045_v14 = vld [vmem:[#allocation8] sm:$0xff]   ;;  %v1046_v15 = vld [vmem:[#allocation8 + $0x8] sm:$0xff]  }
  0x81   :  { %v1044_v13 = vld [vmem:[#allocation7 + $0x38] sm:$0xff]   ;;  %v1047_v16 = vld [vmem:[#allocation8 + $0x10] sm:$0xff]   ;;  %v1049_v18 = vld [vmem:[#allocation8 + $0x20] sm:$0xff]  }
  0x82   :  { %v1048_v17 = vld [vmem:[#allocation8 + $0x18] sm:$0xff]   ;;  %v1050_v19 = vld [vmem:[#allocation8 + $0x28] sm:$0xff]   ;;  %v1051_v28 = vld [vmem:[#allocation8 + $0x30] sm:$0xff]  }
  0x83   :  { %912 = vmatpush3.bf16.msra.mxu0 %v1034_v2  ;;  %924 = vmatpush3.bf16.msra.mxu1 %v1038_v5  ;;  %v808_v20 = vld [vmem:[%s1535_s2] ss:$0 sm:$0xff]  ;;  %v1053_v30 = vld [vmem:[#allocation10] sm:$0xff]   ;;  %v1054_v31 = vld [vmem:[#allocation10 + $0x8] sm:$0xff]  }
  0x84   :  { %913 = vmatprep.subr.bf16.mxu0 %v1272_v0  ;;  %925 = vmatprep.subr.bf16.mxu1 %v1272_v0  ;;  %v1052_v29 = vld [vmem:[#allocation8 + $0x38] sm:$0xff]   ;;  %v1055_v32 = vld [vmem:[#allocation10 + $0x10] sm:$0xff]   ;;  %v1057_v34 = vld [vmem:[#allocation10 + $0x20] sm:$0xff]  }
  0x85   :  { %v1056_v33 = vld [vmem:[#allocation10 + $0x18] sm:$0xff]   ;;  %v1058_v35 = vld [vmem:[#allocation10 + $0x28] sm:$0xff]   ;;  %v1059_v44 = vld [vmem:[#allocation10 + $0x30] sm:$0xff]  }
  0x86   :  { %v814_v36 = vld [vmem:[%s1537_s4] ss:$0 sm:$0xff]  ;;  %v1061_v46 = vld [vmem:[#allocation11] sm:$0xff]   ;;  %v1062_v47 = vld [vmem:[#allocation11 + $0x8] sm:$0xff]  }
  0x87   :  { %914 = vmatpush3.bf16.msra.mxu0 %v1035_v4  ;;  %926 = vmatpush3.bf16.msra.mxu1 %v1039_v7  ;;  %v1060_v45 = vld [vmem:[#allocation10 + $0x38] sm:$0xff]   ;;  %v1063_v48 = vld [vmem:[#allocation11 + $0x10] sm:$0xff]   ;;  %v1065_v50 = vld [vmem:[#allocation11 + $0x20] sm:$0xff]  }
  0x88   :  { %915 = vmatprep.subr.bf16.mxu0 %v1272_v0  ;;  %927 = vmatprep.subr.bf16.mxu1 %v1272_v0  ;;  %v1064_v49 = vld [vmem:[#allocation11 + $0x18] sm:$0xff]   ;;  %v1066_v51 = vld [vmem:[#allocation11 + $0x28] sm:$0xff]   ;;  %v1067_v60 = vld [vmem:[#allocation11 + $0x30] sm:$0xff]  }
  0x89   :  { %v823_v52 = vld [vmem:[%s1539_s6] ss:$0 sm:$0xff]  ;;  %v1069_v62 = vld [vmem:[#allocation13] sm:$0xff]   ;;  %v1070_v63 = vld [vmem:[#allocation13 + $0x8] sm:$0xff]  }
  0x8a   :  { %v1068_v61 = vld [vmem:[#allocation11 + $0x38] sm:$0xff]   ;;  %v1071_v1 = vld [vmem:[#allocation13 + $0x10] sm:$0xff]   ;;  %v1073_v3 = vld [vmem:[#allocation13 + $0x20] sm:$0xff]  }
  0x8b   :  { %916 = vmatpush3.bf16.msra.mxu0 %v1036_v6  ;;  %928 = vmatpush3.bf16.msra.mxu1 %v1040_v9  ;;  %v1072_v2 = vld [vmem:[#allocation13 + $0x18] sm:$0xff]   ;;  %v1074_v4 = vld [vmem:[#allocation13 + $0x28] sm:$0xff]  }
  0x8c   :  { %941 = vmatprep.subr.bf16.mxu0 %v1272_v0  ;;  %929 = vmatprep.subr.bf16.mxu1 %v1272_v0  ;;  %v832_v5 = vld [vmem:[%s1541_s8] ss:$0 sm:$0xff] }
  0x8e   :  { %918 = vmatmul.mubr.msk.bf16.vlgmr.msra.gmra.mrb[0].mxu0 %vm179_vm1, %v139_v8 }
  0x8f   :  { %957 = vmatprep.mubr.msk.bf16.mxu0 %vm1273_vm0, %v1272_v0  ;;  %930 = vmatpush3.bf16.msra.mxu1 %v1041_v10 }
  0x90   :  { %931 = vmatprep.subr.bf16.mxu1 %v1272_v0  ;;  %942 = vmatpush3.bf16.msra.mxu0 %v1045_v14  ;;  %v1076_v14 = vld [vmem:[#allocation13 + $0x38] sm:$0xff]  }
  0x91   :  { %943 = vmatprep.subr.bf16.mxu0 %v1272_v0 }
  0x93   :  { %932 = vmatpush3.bf16.msra.mxu1 %v1042_v11 }
  0x94   :  { %933 = vmatprep.subr.bf16.mxu1 %v1272_v0  ;;  %944 = vmatpush3.bf16.msra.mxu0 %v1046_v15  ;;  %v841_v15 = vld [vmem:[%s1543_s10] ss:$0 sm:$0xff]  ;;  %s1231_s10 = scalar_lea.vmem %s797_s30, 64 }
  0x95   :  { %945 = vmatprep.subr.bf16.mxu0 %v1272_v0  ;;  %p1232_p0 = scmp.ne.s32.totalorder %s797_s30, %s1231_s10  ;;  %p1237_p2 = scmp.lt.s32.totalorder %s1231_s10, %s1231_s10 }
  0x97   :  { %934 = vmatpush3.bf16.msra.mxu1 %v1043_v12  ;;  %p1238_p3 = por %p1237_p2, %p1236_p1 }
  0x98   :  { %935 = vmatprep.subr.bf16.mxu1 %v1272_v0  ;;  %946 = vmatpush3.bf16.msra.mxu0 %v1047_v16 }
  0x99   :  { %947 = vmatprep.subr.bf16.mxu0 %v1272_v0  ;;  %p1239_p4 = pnand %p1238_p3, %p1232_p0 }
  0x9b   :  { %936 = vmatpush3.bf16.msra.mxu1 %v1044_v13  ;;  %v1075_v13 = vld [vmem:[#allocation13 + $0x30] sm:$0xff]  }
  0x9c   :  { %961 = vmatprep.subr.bf16.mxu1 %v1272_v0  ;;  %948 = vmatpush3.bf16.msra.mxu0 %v1048_v17 }
  0x9d   :  { %949 = vmatprep.subr.bf16.mxu0 %v1272_v0 }
  0xa0   :  { %950 = vmatpush3.bf16.msra.mxu0 %v1049_v18 }
  0xa1   :  { %951 = vmatprep.subr.bf16.mxu0 %v1272_v0 }
  0xa4   :  { %952 = vmatpush3.bf16.msra.mxu0 %v1050_v19 }
  0xa5   :  { %953 = vmatprep.subr.bf16.mxu0 %v1272_v0 }
  0xa8   :  { %954 = vmatpush3.bf16.msra.mxu0 %v1051_v28 }
  0xa9   :  { %955 = vmatprep.subr.bf16.mxu0 %v1272_v0 }
  0xac   :  { %956 = vmatpush3.bf16.msra.mxu0 %v1052_v29 }
  0xad   :  { %981 = vmatprep.subr.bf16.mxu0 %v1272_v0 }
 0x161   :  { %v217_v21 = vpop.f32.mrb[0].mxu0 }
 0x162   :  { %v218_v22 = vadd.f32 %v808_v20, %v217_v21  ;;  %v919_v23 = vpop.f32.mrb[1].mxu0 }
 0x163   :  { %v220_v24 = vpop.f32.mrb[2].mxu0  ;;  %v850_v23 = vld [vmem:[%s1545_s12] ss:$0 sm:$0xff] }
 0x164   :  { %v223_v25 = vmax.f32 %v218_v22, 0.0  ;;  %v920_v26 = vpop.f32.mrb[3].mxu0 }
 0x166   :  { %v224_v27 = vpack.c.bf16 %v223_v25, %v223_v25 }
 0x168   :  { %938 = vmatmul.mubr.bf16.vlgmr.msra.gmra.mrb[0].mxu1 %v224_v27 }
 0x169   :  { %977 = vmatprep.mubr.msk.bf16.mxu1 %vm1273_vm0, %v1272_v0  ;;  %962 = vmatpush3.bf16.msra.mxu1 %v1053_v30 }
 0x16a   :  { %963 = vmatprep.subr.bf16.mxu1 %v1272_v0 }
 0x16d   :  { %964 = vmatpush3.bf16.msra.mxu1 %v1054_v31 }
 0x16e   :  { %965 = vmatprep.subr.bf16.mxu1 %v1272_v0 }
 0x171   :  { %966 = vmatpush3.bf16.msra.mxu1 %v1055_v32 }
 0x172   :  { %967 = vmatprep.subr.bf16.mxu1 %v1272_v0 }
 0x175   :  { %968 = vmatpush3.bf16.msra.mxu1 %v1056_v33 }
 0x176   :  { %969 = vmatprep.subr.bf16.mxu1 %v1272_v0 }
 0x179   :  { %970 = vmatpush3.bf16.msra.mxu1 %v1057_v34 }
 0x17a   :  { %971 = vmatprep.subr.bf16.mxu1 %v1272_v0 }
 0x17d   :  { %972 = vmatpush3.bf16.msra.mxu1 %v1058_v35 }
 0x17e   :  { %973 = vmatprep.subr.bf16.mxu1 %v1272_v0 }
 0x181   :  { %974 = vmatpush3.bf16.msra.mxu1 %v1059_v44 }
 0x182   :  { %975 = vmatprep.subr.bf16.mxu1 %v1272_v0 }
 0x185   :  { %976 = vmatpush3.bf16.msra.mxu1 %v1060_v45 }
 0x186   :  { %1001 = vmatprep.subr.bf16.mxu1 %v1272_v0 }
 0x23b   :  { %v330_v37 = vpop.f32.mrb[0].mxu1 }
 0x23c   :  { %v331_v38 = vadd.f32 %v814_v36, %v330_v37  ;;  %v939_v39 = vpop.f32.mrb[1].mxu1 }
 0x23d   :  { %v333_v40 = vpop.f32.mrb[2].mxu1 }
 0x23e   :  { %v336_v41 = vmax.f32 %v331_v38, 0.0  ;;  %v940_v42 = vpop.f32.mrb[3].mxu1 }
 0x240   :  { %v337_v43 = vpack.c.bf16 %v336_v41, %v336_v41 }
 0x242   :  { %958 = vmatmul.mubr.bf16.vlgmr.msra.gmra.mrb[4].mxu0 %v337_v43 }
 0x243   :  { %997 = vmatprep.mubr.msk.bf16.mxu0 %vm1273_vm0, %v1272_v0  ;;  %982 = vmatpush3.bf16.msra.mxu0 %v1061_v46 }
 0x244   :  { %983 = vmatprep.subr.bf16.mxu0 %v1272_v0 }
 0x247   :  { %984 = vmatpush3.bf16.msra.mxu0 %v1062_v47 }
 0x248   :  { %985 = vmatprep.subr.bf16.mxu0 %v1272_v0 }
 0x24b   :  { %986 = vmatpush3.bf16.msra.mxu0 %v1063_v48 }
 0x24c   :  { %987 = vmatprep.subr.bf16.mxu0 %v1272_v0 }
 0x24f   :  { %988 = vmatpush3.bf16.msra.mxu0 %v1064_v49 }
 0x250   :  { %989 = vmatprep.subr.bf16.mxu0 %v1272_v0 }
 0x253   :  { %990 = vmatpush3.bf16.msra.mxu0 %v1065_v50 }
 0x254   :  { %991 = vmatprep.subr.bf16.mxu0 %v1272_v0 }
 0x257   :  { %992 = vmatpush3.bf16.msra.mxu0 %v1066_v51 }
 0x258   :  { %993 = vmatprep.subr.bf16.mxu0 %v1272_v0 }
 0x25b   :  { %994 = vmatpush3.bf16.msra.mxu0 %v1067_v60 }
 0x25c   :  { %995 = vmatprep.subr.bf16.mxu0 %v1272_v0 }
 0x25f   :  { %996 = vmatpush3.bf16.msra.mxu0 %v1068_v61 }
 0x315   :  { %v443_v53 = vpop.f32.mrb[4].mxu0 }
 0x316   :  { %v444_v54 = vadd.f32 %v823_v52, %v443_v53  ;;  %v959_v55 = vpop.f32.mrb[5].mxu0 }
 0x317   :  { %v446_v56 = vpop.f32.mrb[6].mxu0 }
 0x318   :  { %v449_v57 = vmax.f32 %v444_v54, 0.0  ;;  %v960_v58 = vpop.f32.mrb[7].mxu0 }
 0x31a   :  { %v450_v59 = vpack.c.bf16 %v449_v57, %v449_v57 }
 0x31c   :  { %978 = vmatmul.mubr.bf16.vlgmr.msra.gmra.mrb[4].mxu1 %v450_v59 }
 0x31d   :  { %1017 = vmatprep.mubr.msk.bf16.mxu1 %vm1273_vm0, %v1272_v0  ;;  %1002 = vmatpush3.bf16.msra.mxu1 %v1069_v62 }
 0x31e   :  { %1003 = vmatprep.subr.bf16.mxu1 %v1272_v0 }
 0x321   :  { %1004 = vmatpush3.bf16.msra.mxu1 %v1070_v63 }
 0x322   :  { %1005 = vmatprep.subr.bf16.mxu1 %v1272_v0 }
 0x325   :  { %1006 = vmatpush3.bf16.msra.mxu1 %v1071_v1 }
 0x326   :  { %1007 = vmatprep.subr.bf16.mxu1 %v1272_v0 }
 0x329   :  { %1008 = vmatpush3.bf16.msra.mxu1 %v1072_v2 }
 0x32a   :  { %1009 = vmatprep.subr.bf16.mxu1 %v1272_v0 }
 0x32d   :  { %1010 = vmatpush3.bf16.msra.mxu1 %v1073_v3 }
 0x32e   :  { %1011 = vmatprep.subr.bf16.mxu1 %v1272_v0 }
 0x331   :  { %1012 = vmatpush3.bf16.msra.mxu1 %v1074_v4 }
 0x332   :  { %1013 = vmatprep.subr.bf16.mxu1 %v1272_v0 }
 0x335   :  { %1014 = vmatpush3.bf16.msra.mxu1 %v1075_v13 }
 0x336   :  { %1015 = vmatprep.subr.bf16.mxu1 %v1272_v0 }
 0x339   :  { %1016 = vmatpush3.bf16.msra.mxu1 %v1076_v14 }
 0x3ef   :  { %v556_v6 = vpop.f32.mrb[4].mxu1 }
 0x3f0   :  { %v557_v7 = vadd.f32 %v832_v5, %v556_v6  ;;  %v979_v8 = vpop.f32.mrb[5].mxu1 }
 0x3f1   :  { %v559_v9 = vpop.f32.mrb[6].mxu1 }
 0x3f2   :  { %v562_v10 = vmax.f32 %v557_v7, 0.0  ;;  %v980_v11 = vpop.f32.mrb[7].mxu1 }
 0x3f4   :  { %v563_v12 = vpack.c.bf16 %v562_v10, %v562_v10 }
 0x3f6   :  { %998 = vmatmul.mubr.bf16.vlgmr.msra.gmra.mrb[8].mxu0 %v563_v12 }
 0x4c9   :  { %v669_v16 = vpop.f32.mrb[8].mxu0 }
 0x4ca   :  { %v670_v17 = vadd.f32 %v841_v15, %v669_v16  ;;  %v999_v18 = vpop.f32.mrb[9].mxu0 }
 0x4cb   :  { %v672_v19 = vpop.f32.mrb[10].mxu0 }
 0x4cc   :  { %v675_v20 = vmax.f32 %v670_v17, 0.0  ;;  %v1000_v21 = vpop.f32.mrb[11].mxu0 }
 0x4ce   :  { %v676_v22 = vpack.c.bf16 %v675_v20, %v675_v20 }
 0x4d0   :  { %1018 = vmatmul.mubr.bf16.vlgmr.msra.gmra.mrb[8].mxu1 %v676_v22 }
 0x5a3   :  { %v782_v24 = vpop.f32.mrb[8].mxu1 }
 0x5a4   :  { %v783_v0 = vadd.f32 %v850_v23, %v782_v24  ;;  %v1019_v25 = vpop.f32.mrb[9].mxu1 }
 0x5a5   :  { %v785_v26 = vpop.f32.mrb[10].mxu1 }
 0x5a6   :  { %v788_v27 = vpack.c.bf16 %v783_v0, %v783_v0  ;;  %v1020_v28 = vpop.f32.mrb[11].mxu1 }
 0x5a8   :  { %789 = vst [vmem:[#allocation14] sm:$0xf] %v788_v27 }
 0x5a9   :  { %1242 = shalt.err (!%p1239_p4)
}
 0x5aa   :  { %s1243_s12 = scalar_lea.hbm %s1546_s13, 64 }
 0x5ab   :  { %p1244_p5 = scmp.ne.s32.totalorder %s1546_s13, %s1243_s12  ;;  %p1247_p6 = scmp.lt.u32.totalorder %s1243_s12, %s1546_s13 }
 0x5ad   :  { %p1249_p7 = pnand %p1247_p6, %p1244_p5 }
 0x5af   :  { %1252 = shalt.err (!%p1249_p7)
}
 0x5b0   :  { %799 = dma.vmem_to_hbm [thread:$0]  %s797_s30, 64, %s1546_s13, [#allocation4]  }
 0x5b1   :  { %1261 = dma.done.wait [#allocation4], 64  }
 0x5b2   :  { %1262 = vsyncadd [#allocation4], 4294967232 }
 0x5b3   :  { %803 = vsyncpa [#allocation3], 1 }
 0x5b4   :  { %804 = vsyncpa [#allocation6], 1 }
 0x5b5   :  { %805 = vsyncpa [#allocation9], 1 }
 0x5b6   :  { %806 = vsyncpa [#allocation12], 1 }
 0x5b7   :  { %807 = vsyncpa [#allocation4], 1 }

</bundles_post_ra>
